<compile_context>
chip_gen: v7x
topology: tpu7x:2x2x1
jax: 0.10.0
libtpu: 0.0.40
codegen_flags: <defaults>
</compile_context>

<pallas_src>
import jax
import jax.numpy as jnp
import numpy as np
from jax.experimental import pallas as pl
from jax.experimental.pallas import tpu as pltpu

NEG_SLOPE = 0.01   # nn.LeakyReLU default
BN_EPS = 1e-5      # nn.BatchNorm2d default


# ----------------------------- the Pallas kernel ----------------------------
def resblock_kernel(x_ref, bn1_ref, bn2_ref, w1_ref, w2_ref, wd_ref,
                    o_ref, a_ref):
    # x_ref : (B, H, W*Cin)   lane-dense activation slab
    # bn*   : (2, W*Cin)      rows = [scale, bias] (pre-folded, lane-tiled)
    # w1    : (3*W*Cin, W*Cin)    banded 3x3-conv matrix (conv1)
    # w2    : (3*W*Cin, W*Cout)   banded 3x3-conv matrix (conv2)
    # wd    : (W*Cin, W*Cout)     block-diagonal 1x1-conv matrix (identity)
    # o_ref : (B, H, W*Cout)
    # a_ref : VMEM scratch (B, H, 3*W*Cin) — dy-stacked im2col slab
    B, H, WC_in = x_ref.shape
    WC_out = o_ref.shape[2]
    BH = B * H

    def bn_lrelu(h2d, bn_ref):
        # one FMA + one select per element (scale/bias pre-folded in wrapper)
        y = h2d * bn_ref[0:1, :] + bn_ref[1:2, :]
        return jnp.where(y >= 0, y, NEG_SLOPE * y)

    def conv3x3(act2d, w_ref):
        # act2d: (B*H, W*Cin).  Build the (B, H, 3*W*Cin) slab whose ky-th
        # lane block holds input row y+ky-1 (zero outside the image), then do
        # ONE (B*H, 3*W*Cin) @ (3*W*Cin, W*Cout') matmul.  The dx taps live in
        # the banded weight matrix, so every read/write here is full-width.
        act = act2d.reshape(B, H, WC_in)
        zrow = jnp.zeros((B, 1, WC_in), jnp.float32)
        a_ref[:, :, WC_in:2 * WC_in] = act                        # ky = 1
        a_ref[:, 0:1, 0:WC_in] = zrow                             # ky = 0 halo
        a_ref[:, 1:H, 0:WC_in] = act[:, 0:H - 1, :]               # ky = 0
        a_ref[:, 0:H - 1, 2 * WC_in:3 * WC_in] = act[:, 1:H, :]   # ky = 2
        a_ref[:, H - 1:H, 2 * WC_in:3 * WC_in] = zrow             # ky = 2 halo
        a2 = a_ref[...].reshape(BH, 3 * WC_in)
        return jnp.dot(a2, w_ref[...], preferred_element_type=jnp.float32)

    x2 = x_ref[...].reshape(BH, WC_in)

    # identity path: 1x1 conv as block-diagonal matmul (lane-dense output)
    identity = jnp.dot(x2, wd_ref[...], preferred_element_type=jnp.float32)

    h1 = bn_lrelu(x2, bn1_ref)          # BN1 + LeakyReLU
    c1 = conv3x3(h1, w1_ref)            # conv1: (B*H, W*Cin)
    h2 = bn_lrelu(c1, bn2_ref)          # BN2 + LeakyReLU
    c2 = conv3x3(h2, w2_ref)            # conv2: (B*H, W*Cout)

    o_ref[...] = (c2 + identity).reshape(B, H, WC_out).astype(o_ref.dtype)


# ------------------------- wrapper-side weight prep -------------------------
def _conv3x3_to_banded(w, W):
    """torch (O, I, 3, 3) -> (3*W*I, W*O) banded block-Toeplitz matrix.

    Row index = ky*(W*I) + xp*I + c, col index = x*O + d, and
    M[row, col] = w[d, c, ky, kx] with xp = x + kx - 1 (zero outside band),
    which together with the dy-stacked activation slab reproduces a padded
    stride-1 3x3 cross-correlation.
    """
    taps = jnp.transpose(w, (2, 3, 1, 0))            # (ky, kx, I, O)
    bands = []
    for ky in range(3):
        band = sum(jnp.kron(jnp.eye(W, k=1 - kx, dtype=w.dtype), taps[ky, kx])
                   for kx in range(3))
        bands.append(band)
    return jnp.concatenate(bands, axis=0)            # (3*W*I, W*O)


def _conv1x1_to_blockdiag(wd, W):
    """torch (O, I, 1, 1) -> (W*I, W*O) block-diagonal matrix."""
    return jnp.kron(jnp.eye(W, dtype=wd.dtype), wd[:, :, 0, 0].T)


def _fold_bn(gamma, beta, mean, var, W):
    scale = gamma * jax.lax.rsqrt(var + BN_EPS)
    bias = beta - mean * scale
    return jnp.stack([jnp.tile(scale, W), jnp.tile(bias, W)])    # (2, W*C)


def _pick_batch_tile(N):
    # Keep tiles small enough for VMEM (trivial at these sizes) and the grid
    # evenly divisible; on v7x an even grid count keeps both TCs busy.
    for bt in (8, 4, 2, 1):
        if N % bt == 0:
            return bt
    return 1


def resblock_forward(x_nchw, params, *, batch_tile=None):
    N, Cin, H, W = x_nchw.shape
    Cout = params['w2'].shape[0]

    # NCHW -> lane-dense (N, H, W*Cin) slab
    x = jnp.transpose(x_nchw, (0, 2, 3, 1)).reshape(N, H, W * Cin)

    bn1 = _fold_bn(params['bn1_gamma'], params['bn1_beta'],
                   params['bn1_mean'], params['bn1_var'], W)
    bn2 = _fold_bn(params['bn2_gamma'], params['bn2_beta'],
                   params['bn2_mean'], params['bn2_var'], W)
    w1 = _conv3x3_to_banded(params['w1'], W)          # (3*W*Cin, W*Cin)
    w2 = _conv3x3_to_banded(params['w2'], W)          # (3*W*Cin, W*Cout)
    wd = _conv1x1_to_blockdiag(params['wd'], W)       # (W*Cin, W*Cout)

    if batch_tile is None:
        batch_tile = _pick_batch_tile(N)
    grid = (N // batch_tile,)

    out = pl.pallas_call(
        resblock_kernel,
        out_shape=jax.ShapeDtypeStruct((N, H, W * Cout), x.dtype),
        grid_spec=pltpu.PrefetchScalarGridSpec(
            num_scalar_prefetch=0,
            grid=grid,
            in_specs=[
                pl.BlockSpec((batch_tile, H, W * Cin), lambda n: (n, 0, 0)),
                pl.BlockSpec((2, W * Cin), lambda n: (0, 0)),
                pl.BlockSpec((2, W * Cin), lambda n: (0, 0)),
                pl.BlockSpec((3 * W * Cin, W * Cin), lambda n: (0, 0)),
                pl.BlockSpec((3 * W * Cin, W * Cout), lambda n: (0, 0)),
                pl.BlockSpec((W * Cin, W * Cout), lambda n: (0, 0)),
            ],
            out_specs=pl.BlockSpec((batch_tile, H, W * Cout),
                                   lambda n: (n, 0, 0)),
            scratch_shapes=[
                pltpu.VMEM((batch_tile, H, 3 * W * Cin), jnp.float32)],
        ),
        compiler_params=pltpu.CompilerParams(
            dimension_semantics=("parallel",)),
    )(x, bn1, bn2, w1, w2, wd)

    # lane-dense slab -> NCHW
    return jnp.transpose(out.reshape(N, H, W, Cout), (0, 3, 1, 2))


# ----------------------------- pure-JAX reference ---------------------------
def resblock_reference(x, p):
    def bn(h, g, b, m, v):
        g, b, m, v = (a[None, :, None, None] for a in (g, b, m, v))
        return (h - m) / jnp.sqrt(v + BN_EPS) * g + b

    def lrelu(h):
        return jnp.where(h >= 0, h, NEG_SLOPE * h)

    def conv(h, w, pad):
        return jax.lax.conv_general_dilated(
            h, w, window_strides=(1, 1), padding=((pad, pad), (pad, pad)),
            dimension_numbers=('NCHW', 'OIHW', 'NCHW'),
            precision=jax.lax.Precision.HIGHEST)

    identity = conv(x, p['wd'], 0)
    h = lrelu(bn(x, p['bn1_gamma'], p['bn1_beta'], p['bn1_mean'], p['bn1_var']))
    h = conv(h, p['w1'], 1)
    h = lrelu(bn(h, p['bn2_gamma'], p['bn2_beta'], p['bn2_mean'], p['bn2_var']))
    h = conv(h, p['w2'], 1)
    return h + identity


if __name__ == "__main__":
    N, Cin, Cout, H, W = 2, 4, 8, 16, 16   # ResBlock(in_c=4, out_c=8, stride=1)

    key = jax.random.PRNGKey(0)
    ks = jax.random.split(key, 12)
    x = jax.random.normal(ks[0], (N, Cin, H, W), jnp.float32)

    params = dict(
        bn1_gamma=jax.random.uniform(ks[1], (Cin,), jnp.float32, 0.5, 1.5),
        bn1_beta=0.1 * jax.random.normal(ks[2], (Cin,), jnp.float32),
        bn1_mean=0.1 * jax.random.normal(ks[3], (Cin,), jnp.float32),
        bn1_var=jax.random.uniform(ks[4], (Cin,), jnp.float32, 0.5, 1.5),
        bn2_gamma=jax.random.uniform(ks[5], (Cin,), jnp.float32, 0.5, 1.5),
        bn2_beta=0.1 * jax.random.normal(ks[6], (Cin,), jnp.float32),
        bn2_mean=0.1 * jax.random.normal(ks[7], (Cin,), jnp.float32),
        bn2_var=jax.random.uniform(ks[8], (Cin,), jnp.float32, 0.5, 1.5),
        w1=0.2 * jax.random.normal(ks[9], (Cin, Cin, 3, 3), jnp.float32),
        w2=0.2 * jax.random.normal(ks[10], (Cout, Cin, 3, 3), jnp.float32),
        wd=0.2 * jax.random.normal(ks[11], (Cout, Cin, 1, 1), jnp.float32),
    )

    out = jax.block_until_ready(resblock_forward(x, params))
    ref = resblock_reference(x, params)

    assert out.shape == (N, Cout, H, W), out.shape
    np.testing.assert_allclose(np.asarray(out), np.asarray(ref),
                               rtol=2e-3, atol=2e-3)
    print("KERNEL_OK")
</pallas_src>

<mosaic_0001>
module attributes {stable_mosaic.version = 11 : i64} {
  func.func @resblock_kernel(%arg0: i32, %arg1: memref<2x16x64xf32, #tpu.memory_space<vmem>>, %arg2: memref<2x64xf32, #tpu.memory_space<vmem>>, %arg3: memref<2x64xf32, #tpu.memory_space<vmem>>, %arg4: memref<192x64xf32, #tpu.memory_space<vmem>>, %arg5: memref<192x128xf32, #tpu.memory_space<vmem>>, %arg6: memref<64x128xf32, #tpu.memory_space<vmem>>, %arg7: memref<2x16x128xf32, #tpu.memory_space<vmem>>, %arg8: memref<2x16x192xf32, #tpu.memory_space<vmem>>) attributes {dimension_semantics = [#tpu.dimension_semantics<parallel>], iteration_bounds = array<i64: 1>, scalar_prefetch = 0 : i64, scratch_operands = 1 : i64, tpu.core_type = #tpu.core_type<tc>, window_params = [{transform_indices = @transform_0, window_bounds = array<i64: 2, 16, 64>}, {pipeline_mode = #tpu.pipeline_mode<synchronous>, transform_indices = @transform_1, window_bounds = array<i64: 2, 64>}, {pipeline_mode = #tpu.pipeline_mode<synchronous>, transform_indices = @transform_2, window_bounds = array<i64: 2, 64>}, {pipeline_mode = #tpu.pipeline_mode<synchronous>, transform_indices = @transform_3, window_bounds = array<i64: 192, 64>}, {pipeline_mode = #tpu.pipeline_mode<synchronous>, transform_indices = @transform_4, window_bounds = array<i64: 192, 128>}, {pipeline_mode = #tpu.pipeline_mode<synchronous>, transform_indices = @transform_5, window_bounds = array<i64: 64, 128>}, {transform_indices = @transform_6, window_bounds = array<i64: 2, 16, 128>}]} {
    %c0 = arith.constant 0 : index
    %c0_0 = arith.constant 0 : index
    %c0_1 = arith.constant 0 : index
    %0 = vector.load %arg1[%c0, %c0_0, %c0_1] : memref<2x16x64xf32, #tpu.memory_space<vmem>>, vector<2x16x64xf32>
    %1 = vector.shape_cast %0 : vector<2x16x64xf32> to vector<32x64xf32>
    %c0_2 = arith.constant 0 : index
    %c0_3 = arith.constant 0 : index
    %2 = vector.load %arg6[%c0_2, %c0_3] : memref<64x128xf32, #tpu.memory_space<vmem>>, vector<64x128xf32>
    %cst = arith.constant dense<0.000000e+00> : vector<32x128xf32>
    %3 = tpu.matmul %1, %2, %cst {dimension_numbers = #tpu.dot_dimension_numbers<[1], [0], [0], [1], [0, 0, 1, 1], [], []>} : vector<32x64xf32>, vector<64x128xf32>, vector<32x128xf32> -> vector<32x128xf32>
    %c0_4 = arith.constant 0 : index
    %c0_5 = arith.constant 0 : index
    %4 = vector.load %arg2[%c0_4, %c0_5] : memref<2x64xf32, #tpu.memory_space<vmem>>, vector<1x64xf32>
    %5 = vector.broadcast %4 : vector<1x64xf32> to vector<32x64xf32>
    %6 = arith.mulf %1, %5 : vector<32x64xf32>
    %c1 = arith.constant 1 : index
    %c0_6 = arith.constant 0 : index
    %7 = vector.load %arg2[%c1, %c0_6] : memref<2x64xf32, #tpu.memory_space<vmem>>, vector<1x64xf32>
    %8 = vector.broadcast %7 : vector<1x64xf32> to vector<32x64xf32>
    %9 = arith.addf %6, %8 : vector<32x64xf32>
    %cst_7 = arith.constant 0.000000e+00 : f32
    %10 = vector.broadcast %cst_7 : f32 to vector<32x64xf32>
    %11 = arith.cmpf oge, %9, %10 : vector<32x64xf32>
    %cst_8 = arith.constant 0.00999999977 : f32
    %12 = vector.broadcast %cst_8 : f32 to vector<32x64xf32>
    %13 = arith.mulf %12, %9 : vector<32x64xf32>
    %14 = arith.select %11, %9, %13 : vector<32x64xi1>, vector<32x64xf32>
    %15 = vector.shape_cast %14 : vector<32x64xf32> to vector<2x16x64xf32>
    %cst_9 = arith.constant 0.000000e+00 : f32
    %16 = vector.broadcast %cst_9 : f32 to vector<2x1x64xf32>
    %c0_10 = arith.constant 0 : index
    %c0_11 = arith.constant 0 : index
    %c64 = arith.constant 64 : index
    %17 = vector.load %arg8[%c0_10, %c0_11, %c64] : memref<2x16x192xf32, #tpu.memory_space<vmem>>, vector<2x16x64xf32>
    tpu.vector_store %arg8[%c0_10, %c0_11, %c64], %15 {strides = array<i32>} : memref<2x16x192xf32, #tpu.memory_space<vmem>>, vector<2x16x64xf32>,
    %c0_12 = arith.constant 0 : index
    %c0_13 = arith.constant 0 : index
    %c0_14 = arith.constant 0 : index
    %18 = vector.load %arg8[%c0_12, %c0_13, %c0_14] : memref<2x16x192xf32, #tpu.memory_space<vmem>>, vector<2x1x64xf32>
    tpu.vector_store %arg8[%c0_12, %c0_13, %c0_14], %16 {strides = array<i32>} : memref<2x16x192xf32, #tpu.memory_space<vmem>>, vector<2x1x64xf32>,
    %19 = vector.extract_strided_slice %15 {offsets = [0, 0, 0], sizes = [2, 15, 64], strides = [1, 1, 1]} : vector<2x16x64xf32> to vector<2x15x64xf32>
    %c0_15 = arith.constant 0 : index
    %c1_16 = arith.constant 1 : index
    %c0_17 = arith.constant 0 : index
    %20 = vector.load %arg8[%c0_15, %c1_16, %c0_17] : memref<2x16x192xf32, #tpu.memory_space<vmem>>, vector<2x15x64xf32>
    tpu.vector_store %arg8[%c0_15, %c1_16, %c0_17], %19 {strides = array<i32>} : memref<2x16x192xf32, #tpu.memory_space<vmem>>, vector<2x15x64xf32>,
    %21 = vector.extract_strided_slice %15 {offsets = [0, 1, 0], sizes = [2, 15, 64], strides = [1, 1, 1]} : vector<2x16x64xf32> to vector<2x15x64xf32>
    %c0_18 = arith.constant 0 : index
    %c0_19 = arith.constant 0 : index
    %c128 = arith.constant 128 : index
    %22 = vector.load %arg8[%c0_18, %c0_19, %c128] : memref<2x16x192xf32, #tpu.memory_space<vmem>>, vector<2x15x64xf32>
    tpu.vector_store %arg8[%c0_18, %c0_19, %c128], %21 {strides = array<i32>} : memref<2x16x192xf32, #tpu.memory_space<vmem>>, vector<2x15x64xf32>,
    %c0_20 = arith.constant 0 : index
    %c15 = arith.constant 15 : index
    %c128_21 = arith.constant 128 : index
    %23 = vector.load %arg8[%c0_20, %c15, %c128_21] : memref<2x16x192xf32, #tpu.memory_space<vmem>>, vector<2x1x64xf32>
    tpu.vector_store %arg8[%c0_20, %c15, %c128_21], %16 {strides = array<i32>} : memref<2x16x192xf32, #tpu.memory_space<vmem>>, vector<2x1x64xf32>,
    %c0_22 = arith.constant 0 : index
    %c0_23 = arith.constant 0 : index
    %c0_24 = arith.constant 0 : index
    %24 = vector.load %arg8[%c0_22, %c0_23, %c0_24] : memref<2x16x192xf32, #tpu.memory_space<vmem>>, vector<2x16x192xf32>
    %25 = vector.shape_cast %24 : vector<2x16x192xf32> to vector<32x192xf32>
    %c0_25 = arith.constant 0 : index
    %c0_26 = arith.constant 0 : index
    %26 = vector.load %arg4[%c0_25, %c0_26] : memref<192x64xf32, #tpu.memory_space<vmem>>, vector<192x64xf32>
    %cst_27 = arith.constant dense<0.000000e+00> : vector<32x64xf32>
    %27 = tpu.matmul %25, %26, %cst_27 {dimension_numbers = #tpu.dot_dimension_numbers<[1], [0], [0], [1], [0, 0, 1, 1], [], []>} : vector<32x192xf32>, vector<192x64xf32>, vector<32x64xf32> -> vector<32x64xf32>
    %c0_28 = arith.constant 0 : index
    %c0_29 = arith.constant 0 : index
    %28 = vector.load %arg3[%c0_28, %c0_29] : memref<2x64xf32, #tpu.memory_space<vmem>>, vector<1x64xf32>
    %29 = vector.broadcast %28 : vector<1x64xf32> to vector<32x64xf32>
    %30 = arith.mulf %27, %29 : vector<32x64xf32>
    %c1_30 = arith.constant 1 : index
    %c0_31 = arith.constant 0 : index
    %31 = vector.load %arg3[%c1_30, %c0_31] : memref<2x64xf32, #tpu.memory_space<vmem>>, vector<1x64xf32>
    %32 = vector.broadcast %31 : vector<1x64xf32> to vector<32x64xf32>
    %33 = arith.addf %30, %32 : vector<32x64xf32>
    %cst_32 = arith.constant 0.000000e+00 : f32
    %34 = vector.broadcast %cst_32 : f32 to vector<32x64xf32>
    %35 = arith.cmpf oge, %33, %34 : vector<32x64xf32>
    %cst_33 = arith.constant 0.00999999977 : f32
    %36 = vector.broadcast %cst_33 : f32 to vector<32x64xf32>
    %37 = arith.mulf %36, %33 : vector<32x64xf32>
    %38 = arith.select %35, %33, %37 : vector<32x64xi1>, vector<32x64xf32>
    %39 = vector.shape_cast %38 : vector<32x64xf32> to vector<2x16x64xf32>
    %cst_34 = arith.constant 0.000000e+00 : f32
    %40 = vector.broadcast %cst_34 : f32 to vector<2x1x64xf32>
    %c0_35 = arith.constant 0 : index
    %c0_36 = arith.constant 0 : index
    %c64_37 = arith.constant 64 : index
    %41 = vector.load %arg8[%c0_35, %c0_36, %c64_37] : memref<2x16x192xf32, #tpu.memory_space<vmem>>, vector<2x16x64xf32>
    tpu.vector_store %arg8[%c0_35, %c0_36, %c64_37], %39 {strides = array<i32>} : memref<2x16x192xf32, #tpu.memory_space<vmem>>, vector<2x16x64xf32>,
    %c0_38 = arith.constant 0 : index
    %c0_39 = arith.constant 0 : index
    %c0_40 = arith.constant 0 : index
    %42 = vector.load %arg8[%c0_38, %c0_39, %c0_40] : memref<2x16x192xf32, #tpu.memory_space<vmem>>, vector<2x1x64xf32>
    tpu.vector_store %arg8[%c0_38, %c0_39, %c0_40], %40 {strides = array<i32>} : memref<2x16x192xf32, #tpu.memory_space<vmem>>, vector<2x1x64xf32>,
    %43 = vector.extract_strided_slice %39 {offsets = [0, 0, 0], sizes = [2, 15, 64], strides = [1, 1, 1]} : vector<2x16x64xf32> to vector<2x15x64xf32>
    %c0_41 = arith.constant 0 : index
    %c1_42 = arith.constant 1 : index
    %c0_43 = arith.constant 0 : index
    %44 = vector.load %arg8[%c0_41, %c1_42, %c0_43] : memref<2x16x192xf32, #tpu.memory_space<vmem>>, vector<2x15x64xf32>
    tpu.vector_store %arg8[%c0_41, %c1_42, %c0_43], %43 {strides = array<i32>} : memref<2x16x192xf32, #tpu.memory_space<vmem>>, vector<2x15x64xf32>,
    %45 = vector.extract_strided_slice %39 {offsets = [0, 1, 0], sizes = [2, 15, 64], strides = [1, 1, 1]} : vector<2x16x64xf32> to vector<2x15x64xf32>
    %c0_44 = arith.constant 0 : index
    %c0_45 = arith.constant 0 : index
    %c128_46 = arith.constant 128 : index
    %46 = vector.load %arg8[%c0_44, %c0_45, %c128_46] : memref<2x16x192xf32, #tpu.memory_space<vmem>>, vector<2x15x64xf32>
    tpu.vector_store %arg8[%c0_44, %c0_45, %c128_46], %45 {strides = array<i32>} : memref<2x16x192xf32, #tpu.memory_space<vmem>>, vector<2x15x64xf32>,
    %c0_47 = arith.constant 0 : index
    %c15_48 = arith.constant 15 : index
    %c128_49 = arith.constant 128 : index
    %47 = vector.load %arg8[%c0_47, %c15_48, %c128_49] : memref<2x16x192xf32, #tpu.memory_space<vmem>>, vector<2x1x64xf32>
    tpu.vector_store %arg8[%c0_47, %c15_48, %c128_49], %40 {strides = array<i32>} : memref<2x16x192xf32, #tpu.memory_space<vmem>>, vector<2x1x64xf32>,
    %c0_50 = arith.constant 0 : index
    %c0_51 = arith.constant 0 : index
    %c0_52 = arith.constant 0 : index
    %48 = vector.load %arg8[%c0_50, %c0_51, %c0_52] : memref<2x16x192xf32, #tpu.memory_space<vmem>>, vector<2x16x192xf32>
    %49 = vector.shape_cast %48 : vector<2x16x192xf32> to vector<32x192xf32>
    %c0_53 = arith.constant 0 : index
    %c0_54 = arith.constant 0 : index
    %50 = vector.load %arg5[%c0_53, %c0_54] : memref<192x128xf32, #tpu.memory_space<vmem>>, vector<192x128xf32>
    %cst_55 = arith.constant dense<0.000000e+00> : vector<32x128xf32>
    %51 = tpu.matmul %49, %50, %cst_55 {dimension_numbers = #tpu.dot_dimension_numbers<[1], [0], [0], [1], [0, 0, 1, 1], [], []>} : vector<32x192xf32>, vector<192x128xf32>, vector<32x128xf32> -> vector<32x128xf32>
    %52 = arith.addf %51, %3 : vector<32x128xf32>
    %53 = vector.shape_cast %52 : vector<32x128xf32> to vector<2x16x128xf32>
    %c0_56 = arith.constant 0 : index
    %c0_57 = arith.constant 0 : index
    %c0_58 = arith.constant 0 : index
    %54 = vector.load %arg7[%c0_56, %c0_57, %c0_58] : memref<2x16x128xf32, #tpu.memory_space<vmem>>, vector<2x16x128xf32>
    tpu.vector_store %arg7[%c0_56, %c0_57, %c0_58], %53 {strides = array<i32>} : memref<2x16x128xf32, #tpu.memory_space<vmem>>, vector<2x16x128xf32>,
    return
  }
  func.func @transform_0(%arg0: i32) -> (i32, i32, i32) {
    %c0_i32 = arith.constant 0 : i32
    %c0_i32_0 = arith.constant 0 : i32
    %c0_i32_1 = arith.constant 0 : i32
    return %arg0, %c0_i32, %c0_i32_0 : i32, i32, i32
  }
  func.func @transform_1(%arg0: i32) -> (i32, i32) {
    %c0_i32 = arith.constant 0 : i32
    %c0_i32_0 = arith.constant 0 : i32
    %c0_i32_1 = arith.constant 0 : i32
    return %c0_i32, %c0_i32_0 : i32, i32
  }
  func.func @transform_2(%arg0: i32) -> (i32, i32) {
    %c0_i32 = arith.constant 0 : i32
    %c0_i32_0 = arith.constant 0 : i32
    %c0_i32_1 = arith.constant 0 : i32
    return %c0_i32, %c0_i32_0 : i32, i32
  }
  func.func @transform_3(%arg0: i32) -> (i32, i32) {
    %c0_i32 = arith.constant 0 : i32
    %c0_i32_0 = arith.constant 0 : i32
    %c0_i32_1 = arith.constant 0 : i32
    return %c0_i32, %c0_i32_0 : i32, i32
  }
  func.func @transform_4(%arg0: i32) -> (i32, i32) {
    %c0_i32 = arith.constant 0 : i32
    %c0_i32_0 = arith.constant 0 : i32
    %c0_i32_1 = arith.constant 0 : i32
    return %c0_i32, %c0_i32_0 : i32, i32
  }
  func.func @transform_5(%arg0: i32) -> (i32, i32) {
    %c0_i32 = arith.constant 0 : i32
    %c0_i32_0 = arith.constant 0 : i32
    %c0_i32_1 = arith.constant 0 : i32
    return %c0_i32, %c0_i32_0 : i32, i32
  }
  func.func @transform_6(%arg0: i32) -> (i32, i32, i32) {
    %c0_i32 = arith.constant 0 : i32
    %c0_i32_0 = arith.constant 0 : i32
    %c0_i32_1 = arith.constant 0 : i32
    return %arg0, %c0_i32, %c0_i32_0 : i32, i32, i32
  }
}

</mosaic_0001>

<bundles_post_ra>
// kernel: tpu_custom_call.1
= control target key start
LH: loop header
LB: loop body
LE: loop exit
PB: predicated region body
PF: predicated region fallthrough
CT: control target
= control target key end

     0   :  { %vm36_vm0 = vcmask 523264   ;;  %v750_v14 = vmov 0.0|0.0   ;;  %vm204_vm4 = vcmask 1046528   ;;  %s751_s19 = smov 64   ;;  %vm216_vm6 = vcmask 522240   ;;  %s1117_s0 = inlined_call_operand.vmem [shape: f32[2,16,64], index: 0, kind: input, shape index: {}]   ;;  %s1118_s1 = inlined_call_operand.vmem [shape: f32[2,64], index: 1, kind: input, shape index: {}]   ;;  %s1119_s2 = inlined_call_operand.vmem [shape: f32[2,64], index: 2, kind: input, shape index: {}]   ;;  %s1120_s3 = inlined_call_operand.vmem [shape: f32[192,64], index: 3, kind: input, shape index: {}]   ;;  %s1121_s4 = inlined_call_operand.vmem [shape: f32[192,128], index: 4, kind: input, shape index: {}]   ;;  %s1122_s5 = inlined_call_operand.vmem [shape: f32[64,128], index: 5, kind: input, shape index: {}]   ;;  %s1123_s6 = inlined_call_operand.hbm [shape: f32[2,16,128], index: 6, kind: output, shape index: {}]  }
   0x1   :  { %v24_v0 = vld [vmem:[%s1117_s0] sm:$0xff]  ;;  %v803_v4 = vld [vmem:[%s1117_s0 + $0x8] sm:$0xff]  ;;  %v808_v5 = vld [vmem:[%s1117_s0 + $0x10] sm:$0xff]  ;;  %648 = vmatprep.subr.bf16.mxu1 %v750_v14 }
   0x2   :  { %v586_v1 = vld [vmem:[%s1118_s1] ss:$0 sm:$0xff]  ;;  %v587_v2 = vld [vmem:[%s1118_s1 + $0x1] ss:$0 sm:$0xff]  ;;  %v813_v6 = vld [vmem:[%s1117_s0 + $0x18] sm:$0xff]  ;;  %626 = vmatprep.mubr.msk.f32.mxu0 %vm36_vm0, %v24_v0 }
   0x3   :  { %v139_v3 = vmul.f32 %v586_v1, %v24_v0  ;;  %v140_v7 = vmul.f32 %v586_v1, %v803_v4  ;;  %v141_v8 = vmul.f32 %v586_v1, %v808_v5  ;;  %v142_v9 = vmul.f32 %v586_v1, %v813_v6  ;;  %v230_v10 = vld [vmem:[%s1120_s3] sm:$0xff]  ;;  %v231_v11 = vld [vmem:[%s1120_s3 + $0x8] sm:$0xff]  ;;  %v232_v12 = vld [vmem:[%s1120_s3 + $0x10] sm:$0xff] }
   0x4   :  { %v649_v15 = vpack.c.bf16 %v231_v11, %v230_v10  ;;  %v233_v16 = vld [vmem:[%s1120_s3 + $0x18] sm:$0xff]  ;;  %v234_v22 = vld [vmem:[%s1120_s3 + $0x20] sm:$0xff]  ;;  %v235_v23 = vld [vmem:[%s1120_s3 + $0x28] sm:$0xff] }
   0x5   :  { %v148_v13 = vadd.f32 %v587_v2, %v139_v3  ;;  %v149_v17 = vadd.f32 %v587_v2, %v140_v7  ;;  %v150_v18 = vadd.f32 %v587_v2, %v141_v8  ;;  %v151_v19 = vadd.f32 %v587_v2, %v142_v9  ;;  %v236_v36 = vld [vmem:[%s1120_s3 + $0x30] sm:$0xff]  ;;  %v237_v37 = vld [vmem:[%s1120_s3 + $0x38] sm:$0xff] }
   0x6   :  { %650 = vmatpush1.bf16.msra.mxu1 %v649_v15  ;;  %v652_v21 = vpack.c.bf16 %v233_v16, %v232_v12  ;;  %v655_v33 = vpack.c.bf16 %v235_v23, %v234_v22 }
   0x7   :  { %vm152_vm1 = vcmp.ge.f32.partialorder %v148_v13, 0.0  ;;  %v156_v20 = vmul.f32 0.01, %v148_v13  ;;  %vm153_vm2 = vcmp.ge.f32.partialorder %v149_v17, 0.0  ;;  %v157_v24 = vmul.f32 0.01, %v149_v17  ;;  %651 = vmatprep.subr.bf16.mxu1 %v750_v14 }
   0x8   :  { %vm154_vm3 = vcmp.ge.f32.partialorder %v150_v18, 0.0  ;;  %v158_v25 = vmul.f32 0.01, %v150_v18  ;;  %vm155_vm5 = vcmp.ge.f32.partialorder %v151_v19, 0.0  ;;  %v159_v27 = vmul.f32 0.01, %v151_v19 }
   0x9   :  { %v839_v26 = vsel %vm152_vm1, %v148_v13, %v156_v20  ;;  %v161_v29 = vsel %vm153_vm2, %v149_v17, %v157_v24 }
   0xa   :  { %168 = vrot.lane.b32.xlu0 %v839_v26, %s751_s19  ;;  %v205_v28 = vrot.slane %v839_v26, 1  ;;  %v844_v30 = vsel %vm154_vm3, %v150_v18, %v158_v25  ;;  %v206_v31 = vrot.slane %v161_v29, 1  ;;  %653 = vmatpush1.bf16.msra.mxu1 %v652_v21  ;;  %v190_v34 = vrot.slane %v161_v29, 7 }
   0xb   :  { %172 = vrot.lane.b32.xlu1 %v844_v30, %s751_s19  ;;  %v208_v32 = vrot.slane %v844_v30, 1  ;;  %v163_v35 = vsel %vm155_vm5, %v151_v19, %v159_v27  ;;  %654 = vmatprep.subr.bf16.mxu1 %v750_v14 }
   0xc   :  { %217 = vst.msk [vmem:[#allocation2 + $0x18] sm:$0x7f] %vm216_vm6, %v206_v31  ;;  %v207_v38 = vsel %vm204_vm4, %v205_v28, %v206_v31  ;;  %v193_v39 = vrot.slane %v163_v35, 7  ;;  %v209_v40 = vrot.slane %v163_v35, 1 }
   0xd   :  { %11 = vsyncpa [#allocation4], 0  ;;  %v189_v41 = vrot.slane %v839_v26, 7  ;;  %215 = vst.msk [vmem:[#allocation2 + $0x8] sm:$0xff] %vm36_vm0, %v207_v38  ;;  %v192_v42 = vrot.slane %v844_v30, 7  ;;  %vm185_vm7 = vcmask 516096   ;;  %v658_v44 = vpack.c.bf16 %v237_v37, %v236_v36 }
   0xe   :  { %170 = vrot.lane.b32.xlu0 %v161_v29, %s751_s19  ;;  %219 = vst.msk [vmem:[#allocation2 + $0x38] sm:$0x7f] %vm216_vm6, %v209_v40  ;;  %v210_v43 = vsel %vm204_vm4, %v208_v32, %v209_v40  ;;  %656 = vmatpush1.bf16.msra.mxu1 %v655_v33  ;;  %v752_v45 = vmov 0.0   ;;  %vm188_vm8 = vcmask 1040384   ;;  %v238_v46 = vld [vmem:[%s1120_s3 + $0x40] sm:$0xff]  ;;  %v239_v47 = vld [vmem:[%s1120_s3 + $0x48] sm:$0xff] }
   0xf   :  { %174 = vrot.lane.b32.xlu1 %v163_v35, %s751_s19  ;;  %220 = vst.msk [vmem:[#allocation2 + $0x1f] sm:$0x1] %vm185_vm7, %v752_v45  ;;  %221 = vst.msk [vmem:[#allocation2 + $0x3f] sm:$0x1] %vm185_vm7, %v752_v45  ;;  %657 = vmatprep.subr.bf16.mxu1 %v750_v14  ;;  %v191_v48 = vsel %vm188_vm8, %v189_v41, %v190_v34  ;;  %v194_v49 = vsel %vm188_vm8, %v192_v42, %v193_v39  ;;  %v240_v51 = vld [vmem:[%s1120_s3 + $0x50] sm:$0xff]  ;;  %v241_v52 = vld [vmem:[%s1120_s3 + $0x58] sm:$0xff] }
  0x10   :  { %218 = vst.msk [vmem:[#allocation2 + $0x28] sm:$0xff] %vm36_vm0, %v210_v43  ;;  %v661_v50 = vpack.c.bf16 %v239_v47, %v238_v46  ;;  %v664_v56 = vpack.c.bf16 %v241_v52, %v240_v51  ;;  %v242_v57 = vld [vmem:[%s1120_s3 + $0x60] sm:$0xff]  ;;  %v243_v58 = vld [vmem:[%s1120_s3 + $0x68] sm:$0xff]  ;;  %v244_v60 = vld [vmem:[%s1120_s3 + $0x70] sm:$0xff]  ;;  %vm180_vm9 = vcmask 1048064   ;;  %vm199_vm10 = vcmask 523265  }
  0x11   :  { %v667_v59 = vpack.c.bf16 %v243_v58, %v242_v57  ;;  %v245_v61 = vld [vmem:[%s1120_s3 + $0x78] sm:$0xff]  ;;  %v246_v63 = vld [vmem:[%s1120_s3 + $0x80] sm:$0xff]  ;;  %v247_v0 = vld [vmem:[%s1120_s3 + $0x88] sm:$0xff] }
  0x12   :  { %659 = vmatpush1.bf16.msra.mxu1 %v658_v44  ;;  %v670_v62 = vpack.c.bf16 %v245_v61, %v244_v60  ;;  %v673_v1 = vpack.c.bf16 %v247_v0, %v246_v63  ;;  %v248_v2 = vld [vmem:[%s1120_s3 + $0x90] sm:$0xff]  ;;  %v249_v3 = vld [vmem:[%s1120_s3 + $0x98] sm:$0xff]  ;;  %v250_v8 = vld [vmem:[%s1120_s3 + $0xa0] sm:$0xff] }
  0x13   :  { %660 = vmatprep.subr.bf16.mxu1 %v750_v14  ;;  %v676_v7 = vpack.c.bf16 %v249_v3, %v248_v2  ;;  %v251_v9 = vld [vmem:[%s1120_s3 + $0xa8] sm:$0xff]  ;;  %v252_v11 = vld [vmem:[%s1120_s3 + $0xb0] sm:$0xff]  ;;  %v253_v12 = vld [vmem:[%s1120_s3 + $0xb8] sm:$0xff] }
  0x14   :  { %v223_v53 = vld [vmem:[#allocation2 + $0x8] sm:$0xff]  ;;  %v679_v10 = vpack.c.bf16 %v251_v9, %v250_v8  ;;  %v682_v13 = vpack.c.bf16 %v253_v12, %v252_v11  ;;  %v28_v24 = vld [vmem:[%s1122_s5] sm:$0xff]  ;;  %v30_v27 = vld [vmem:[%s1122_s5 + $0x10] sm:$0xff] }
  0x15   :  { %588 = vmatprep.mubr.msk.f32.mxu1 %vm36_vm0, %v223_v53  ;;  %v29_v25 = vld [vmem:[%s1122_s5 + $0x8] sm:$0xff]  ;;  %v31_v28 = vld [vmem:[%s1122_s5 + $0x18] sm:$0xff]  ;;  %v32_v30 = vld [vmem:[%s1122_s5 + $0x20] sm:$0xff] }
  0x16   :  { %v225_v54 = vld [vmem:[#allocation2 + $0x18] sm:$0xff]  ;;  %662 = vmatpush1.bf16.msra.mxu1 %v661_v50  ;;  %v632_v26 = vpack.c.bf16 %v29_v25, %v28_v24  ;;  %v636_v29 = vpack.c.bf16 %v31_v28, %v30_v27  ;;  %v33_v31 = vld [vmem:[%s1122_s5 + $0x28] sm:$0xff]  ;;  %v34_v33 = vld [vmem:[%s1122_s5 + $0x30] sm:$0xff] }
  0x17   :  { %v229_v55 = vld [vmem:[#allocation2 + $0x38] sm:$0xff]  ;;  %431 = vst.msk [vmem:[#allocation2 + $0x1f] sm:$0x1] %vm185_vm7, %v752_v45  ;;  %663 = vmatprep.subr.bf16.mxu1 %v750_v14  ;;  %v227_v20 = vld [vmem:[#allocation2 + $0x28] sm:$0xff]  ;;  %v640_v32 = vpack.c.bf16 %v33_v31, %v32_v30  ;;  %v441_v36 = vld [vmem:[%s1121_s4] sm:$0xff] }
  0x18   :  { %432 = vst.msk [vmem:[#allocation2 + $0x3f] sm:$0x1] %vm185_vm7, %v752_v45  ;;  %633 = vmatprep.subr.bf16.mxu0 %v632_v26  ;;  %v35_v34 = vld [vmem:[%s1122_s5 + $0x38] sm:$0xff]  ;;  %v442_v37 = vld [vmem:[%s1121_s4 + $0x8] sm:$0xff]  ;;  %v443_v38 = vld [vmem:[%s1121_s4 + $0x10] sm:$0xff] }
  0x19   :  { %635 = vmatpush3.bf16.msra.mxu0 %v632_v26  ;;  %v644_v35 = vpack.c.bf16 %v35_v34, %v34_v33  ;;  %v685_v39 = vpack.c.bf16 %v442_v37, %v441_v36  ;;  %v446_v40 = vld [vmem:[%s1121_s4 + $0x28] sm:$0xff]  ;;  %v448_v43 = vld [vmem:[%s1121_s4 + $0x38] sm:$0xff]  ;;  %v449_v46 = vld [vmem:[%s1121_s4 + $0x40] sm:$0xff] }
  0x1a   :  { %665 = vmatpush1.bf16.msra.mxu1 %v664_v56  ;;  %637 = vmatprep.subr.bf16.mxu0 %v636_v29  ;;  %v450_v47 = vld [vmem:[%s1121_s4 + $0x48] sm:$0xff]  ;;  %v452_v50 = vld [vmem:[%s1121_s4 + $0x58] sm:$0xff]  ;;  %v453_v52 = vld [vmem:[%s1121_s4 + $0x60] sm:$0xff] }
  0x1b   :  { %666 = vmatprep.subr.bf16.mxu1 %v750_v14  ;;  %v454_v53 = vld [vmem:[%s1121_s4 + $0x68] sm:$0xff]  ;;  %v456_v56 = vld [vmem:[%s1121_s4 + $0x78] sm:$0xff]  ;;  %v457_v58 = vld [vmem:[%s1121_s4 + $0x80] sm:$0xff] }
  0x1c   :  { %v459_v61 = vld [vmem:[%s1121_s4 + $0x90] sm:$0xff]  ;;  %v461_v0 = vld [vmem:[%s1121_s4 + $0xa0] sm:$0xff]  ;;  %v464_v8 = vld [vmem:[%s1121_s4 + $0xb8] sm:$0xff] }
  0x1d   :  { %639 = vmatpush3.bf16.msra.mxu0 %v636_v29  ;;  %v592_v3 = vld [vmem:[%s1119_s2] ss:$0 sm:$0xff]  ;;  %v593_v11 = vld [vmem:[%s1119_s2 + $0x1] ss:$0 sm:$0xff]  ;;  %s753_s2 = smov [#allocation3]  }
  0x1e   :  { %668 = vmatpush1.bf16.msra.mxu1 %v667_v59  ;;  %641 = vmatprep.subr.bf16.mxu0 %v640_v32  ;;  %v458_v59 = vld [vmem:[%s1121_s4 + $0x88] sm:$0xff] }
  0x1f   :  { %669 = vmatprep.subr.bf16.mxu1 %v750_v14  ;;  %v709_v60 = vpack.c.bf16 %v458_v59, %v457_v58 }
  0x21   :  { %643 = vmatpush3.bf16.msra.mxu0 %v640_v32 }
  0x22   :  { %671 = vmatpush1.bf16.msra.mxu1 %v670_v62  ;;  %645 = vmatprep.subr.bf16.mxu0 %v644_v35  ;;  %v460_v62 = vld [vmem:[%s1121_s4 + $0x98] sm:$0xff] }
  0x23   :  { %672 = vmatprep.subr.bf16.mxu1 %v750_v14  ;;  %v712_v63 = vpack.c.bf16 %v460_v62, %v459_v61 }
  0x25   :  { %647 = vmatpush3.bf16.msra.mxu0 %v644_v35 }
  0x26   :  { %674 = vmatpush1.bf16.msra.mxu1 %v673_v1  ;;  %684 = vmatprep.subr.bf16.mxu0 %v750_v14  ;;  %v462_v1 = vld [vmem:[%s1121_s4 + $0xa8] sm:$0xff] }
  0x27   :  { %675 = vmatprep.subr.bf16.mxu1 %v750_v14  ;;  %v715_v2 = vpack.c.bf16 %v462_v1, %v461_v0 }
  0x28   :  { %627 = vmatmul.mubr.msk.f32.vlgmr.msra.gmra.mrb[0].mxu0 %vm36_vm0, %v803_v4  ;;  %v444_v4 = vld [vmem:[%s1121_s4 + $0x18] sm:$0xff] }
  0x29   :  { %629 = vmatprep.mubr.msk.f32.mxu0 %vm36_vm0, %v808_v5  ;;  %686 = vmatpush1.bf16.msra.mxu0 %v685_v39  ;;  %v688_v5 = vpack.c.bf16 %v444_v4, %v443_v38 }
  0x2a   :  { %677 = vmatpush1.bf16.msra.mxu1 %v676_v7  ;;  %687 = vmatprep.subr.bf16.mxu0 %v750_v14  ;;  %v463_v7 = vld [vmem:[%s1121_s4 + $0xb0] sm:$0xff] }
  0x2b   :  { %678 = vmatprep.subr.bf16.mxu1 %v750_v14  ;;  %v718_v9 = vpack.c.bf16 %v464_v8, %v463_v7 }
  0x2c   :  { %630 = vmatmul.mubr.msk.f32.gmra.mrb[2].mxu0 %vm36_vm0, %v813_v6  ;;  %v445_v6 = vld [vmem:[%s1121_s4 + $0x20] sm:$0xff] }
  0x2d   :  { %689 = vmatpush1.bf16.msra.mxu0 %v688_v5 }
  0x2e   :  { %680 = vmatpush1.bf16.msra.mxu1 %v679_v10  ;;  %690 = vmatprep.subr.bf16.mxu0 %v750_v14 }
  0x2f   :  { %681 = vmatprep.subr.bf16.mxu1 %v750_v14 }
  0x32   :  { %683 = vmatpush1.bf16.msra.mxu1 %v682_v13 }
  0x7c   :  { %v169_v15 = vpop.permute.xlu0 %168 }
  0x7d   :  { %181 = vst.msk [vmem:[#allocation2] sm:$0xff] %vm180_vm9, %v169_v15  ;;  %v173_v16 = vpop.permute.xlu1 %172 }
  0x7e   :  { %186 = vst.msk [vmem:[#allocation2] sm:$0x1] %vm185_vm7, %v752_v45 }
  0x7f   :  { %200 = vst.msk [vmem:[#allocation2] sm:$0xfe] %vm199_vm10, %v189_v41  ;;  %v691_v41 = vpack.c.bf16 %v446_v40, %v445_v6 }
  0x80   :  { %183 = vst.msk [vmem:[#allocation2 + $0x20] sm:$0xff] %vm180_vm9, %v173_v16  ;;  %v171_v17 = vpop.permute.xlu0 %170 }
  0x81   :  { %187 = vst.msk [vmem:[#allocation2 + $0x20] sm:$0x1] %vm185_vm7, %v752_v45  ;;  %v175_v18 = vpop.permute.xlu1 %174  ;;  %692 = vmatpush1.bf16.msra.mxu0 %v691_v41 }
  0x82   :  { %202 = vst.msk [vmem:[#allocation2 + $0x20] sm:$0xfe] %vm199_vm10, %v192_v42  ;;  %v447_v42 = vld [vmem:[%s1121_s4 + $0x30] sm:$0xff]  ;;  %693 = vmatprep.subr.bf16.mxu0 %v750_v14 }
  0x83   :  { %182 = vst.msk [vmem:[#allocation2 + $0x10] sm:$0xff] %vm180_vm9, %v171_v17  ;;  %184 = vst.msk [vmem:[#allocation2 + $0x30] sm:$0xff] %vm180_vm9, %v175_v18  ;;  %v694_v44 = vpack.c.bf16 %v448_v43, %v447_v42 }
  0x84   :  { %201 = vst.msk [vmem:[#allocation2 + $0x10] sm:$0xff] %vm36_vm0, %v191_v48  ;;  %203 = vst.msk [vmem:[#allocation2 + $0x30] sm:$0xff] %vm36_vm0, %v194_v49  ;;  %v697_v48 = vpack.c.bf16 %v450_v47, %v449_v46  ;;  %v451_v49 = vld [vmem:[%s1121_s4 + $0x50] sm:$0xff] }
  0x85   :  { %695 = vmatpush1.bf16.msra.mxu0 %v694_v44  ;;  %v700_v51 = vpack.c.bf16 %v452_v50, %v451_v49 }
  0x86   :  { %v222_v19 = vld [vmem:[#allocation2] sm:$0xff]  ;;  %696 = vmatprep.subr.bf16.mxu0 %v750_v14 }
  0x87   :  { %331 = vmatmul.mubr.f32.vlgmr.msra.gmra.mrb[0].mxu1 %v222_v19 }
  0x88   :  { %589 = vmatprep.mubr.msk.f32.mxu1 %vm36_vm0, %v225_v54  ;;  %v703_v54 = vpack.c.bf16 %v454_v53, %v453_v52 }
  0x89   :  { %v226_v22 = vld [vmem:[#allocation2 + $0x20] sm:$0xff]  ;;  %698 = vmatpush1.bf16.msra.mxu0 %v697_v48 }
  0x8a   :  { %699 = vmatprep.subr.bf16.mxu0 %v750_v14 }
  0x8b   :  { %v224_v21 = vld [vmem:[#allocation2 + $0x10] sm:$0xff] }
  0x8c   :  { %336 = vmatmul.mubr.f32.gmra.mrb[2].mxu1 %v224_v21  ;;  %v228_v23 = vld [vmem:[#allocation2 + $0x30] sm:$0xff] }
  0x8d   :  { %590 = vmatprep.mubr.msk.f32.mxu1 %vm36_vm0, %v227_v20  ;;  %701 = vmatpush1.bf16.msra.mxu0 %v700_v51 }
  0x8e   :  { %702 = vmatprep.subr.bf16.mxu0 %v750_v14 }
  0x90   :  { %341 = vmatmul.mubr.f32.gmra.mrb[4].mxu1 %v226_v22 }
  0x91   :  { %591 = vmatprep.mubr.msk.f32.mxu1 %vm36_vm0, %v229_v55  ;;  %v455_v55 = vld [vmem:[%s1121_s4 + $0x70] sm:$0xff]  ;;  %704 = vmatpush1.bf16.msra.mxu0 %v703_v54  ;;  %s571_s4 = sshll.u32 %s753_s2, 4  ;;  %s572_s4 = int_to_ptr.vmem [resolvable:$true] %s571_s4 }
  0x92   :  { %v706_v57 = vpack.c.bf16 %v456_v56, %v455_v55  ;;  %705 = vmatprep.subr.bf16.mxu0 %v750_v14  ;;  %p731_p1 = scmp.lt.s32.totalorder %s572_s4, %s572_s4 }
  0x94   :  { %346 = vmatmul.mubr.f32.gmra.mrb[6].mxu1 %v228_v23 }
  0x95   :  { %707 = vmatpush1.bf16.msra.mxu0 %v706_v57 }
  0x96   :  { %708 = vmatprep.subr.bf16.mxu0 %v750_v14 }
  0x99   :  { %710 = vmatpush1.bf16.msra.mxu0 %v709_v60 }
  0x9a   :  { %711 = vmatprep.subr.bf16.mxu0 %v750_v14 }
  0x9d   :  { %713 = vmatpush1.bf16.msra.mxu0 %v712_v63 }
  0x9e   :  { %714 = vmatprep.subr.bf16.mxu0 %v750_v14 }
  0xa1   :  { %716 = vmatpush1.bf16.msra.mxu0 %v715_v2 }
  0xa2   :  { %717 = vmatprep.subr.bf16.mxu0 %v750_v14 }
  0xa5   :  { %719 = vmatpush1.bf16.msra.mxu0 %v718_v9 }
  0xfb   :  { %v628_v46 = vpop.f32.mrb[0].mxu0 }
  0xfc   :  { %v115_v47 = vpop.f32.mrb[1].mxu0 }
  0xff   :  { %v631_v48 = vpop.f32.mrb[2].mxu0 }
 0x100   :  { %v125_v49 = vpop.f32.mrb[3].mxu0 }
 0x15a   :  { %v332_v10 = vpop.f32.mrb[0].mxu1 }
 0x15b   :  { %v356_v12 = vmul.f32 %v592_v3, %v332_v10  ;;  %v334_v13 = vpop.f32.mrb[1].mxu1 }
 0x15d   :  { %v365_v15 = vadd.f32 %v593_v11, %v356_v12 }
 0x15f   :  { %v337_v16 = vpop.f32.mrb[2].mxu1  ;;  %vm369_vm11 = vcmp.ge.f32.partialorder %v365_v15, 0.0  ;;  %v373_v18 = vmul.f32 0.01, %v365_v15 }
 0x160   :  { %v357_v14 = vmul.f32 %v592_v3, %v337_v16  ;;  %v339_v17 = vpop.f32.mrb[3].mxu1 }
 0x161   :  { %v377_v20 = vsel %vm369_vm11, %v365_v15, %v373_v18 }
 0x162   :  { %v366_v19 = vadd.f32 %v593_v11, %v357_v14  ;;  %385 = vrot.lane.b32.xlu0 %v377_v20, %s751_s19  ;;  %v403_v27 = vrot.slane %v377_v20, 7  ;;  %v417_v28 = vrot.slane %v377_v20, 1 }
 0x163   :  { %v342_v21 = vpop.f32.mrb[4].mxu1 }
 0x164   :  { %v358_v22 = vmul.f32 %v592_v3, %v342_v21  ;;  %v344_v23 = vpop.f32.mrb[5].mxu1  ;;  %vm370_vm12 = vcmp.ge.f32.partialorder %v366_v19, 0.0  ;;  %v374_v24 = vmul.f32 0.01, %v366_v19 }
 0x166   :  { %v367_v25 = vadd.f32 %v593_v11, %v358_v22  ;;  %v378_v26 = vsel %vm370_vm12, %v366_v19, %v374_v24 }
 0x167   :  { %387 = vrot.lane.b32.xlu1 %v378_v26, %s751_s19  ;;  %v404_v29 = vrot.slane %v378_v26, 7  ;;  %v418_v30 = vrot.slane %v378_v26, 1  ;;  %v347_v31 = vpop.f32.mrb[6].mxu1 }
 0x168   :  { %v359_v32 = vmul.f32 %v592_v3, %v347_v31  ;;  %v349_v33 = vpop.f32.mrb[7].mxu1  ;;  %vm371_vm13 = vcmp.ge.f32.partialorder %v367_v25, 0.0  ;;  %v375_v34 = vmul.f32 0.01, %v367_v25 }
 0x169   :  { %v419_v35 = vsel %vm204_vm4, %v417_v28, %v418_v30  ;;  %428 = vst.msk [vmem:[#allocation2 + $0x18] sm:$0x7f] %vm216_vm6, %v418_v30  ;;  %v405_v36 = vsel %vm188_vm8, %v403_v27, %v404_v29 }
 0x16a   :  { %427 = vst.msk [vmem:[#allocation2 + $0x8] sm:$0xff] %vm36_vm0, %v419_v35  ;;  %v368_v37 = vadd.f32 %v593_v11, %v359_v32  ;;  %v379_v38 = vsel %vm371_vm13, %v367_v25, %v375_v34 }
 0x16b   :  { %389 = vrot.lane.b32.xlu0 %v379_v38, %s751_s19  ;;  %v406_v5 = vrot.slane %v379_v38, 7  ;;  %v420_v6 = vrot.slane %v379_v38, 1 }
 0x16c   :  { %vm372_vm14 = vcmp.ge.f32.partialorder %v368_v37, 0.0  ;;  %v376_v39 = vmul.f32 0.01, %v368_v37 }
 0x16e   :  { %v380_v4 = vsel %vm372_vm14, %v368_v37, %v376_v39 }
 0x16f   :  { %391 = vrot.lane.b32.xlu1 %v380_v4, %s751_s19  ;;  %v407_v40 = vrot.slane %v380_v4, 7  ;;  %v421_v41 = vrot.slane %v380_v4, 1  ;;  %s726_s19 = scalar_lea.vmem %s572_s4, 512 }
 0x170   :  { %v436_v54 = vld [vmem:[#allocation2 + $0x18] sm:$0xff]  ;;  %p727_p0 = scmp.ne.s32.totalorder %s572_s4, %s726_s19  ;;  %p732_p2 = scmp.lt.s32.totalorder %s726_s19, %s726_s19 }
 0x171   :  { %v422_v42 = vsel %vm204_vm4, %v420_v6, %v421_v41  ;;  %430 = vst.msk [vmem:[#allocation2 + $0x38] sm:$0x7f] %vm216_vm6, %v421_v41  ;;  %v434_v43 = vld [vmem:[#allocation2 + $0x8] sm:$0xff]  ;;  %v408_v44 = vsel %vm188_vm8, %v406_v5, %v407_v40 }
 0x172   :  { %429 = vst.msk [vmem:[#allocation2 + $0x28] sm:$0xff] %vm36_vm0, %v422_v42  ;;  %594 = vmatprep.mubr.msk.f32.mxu0 %vm36_vm0, %v434_v43  ;;  %p733_p3 = por %p732_p2, %p731_p1 }
 0x174   :  { %p734_p4 = pnand %p733_p3, %p727_p0 }
 0x178   :  { %v440_v59 = vld [vmem:[#allocation2 + $0x38] sm:$0xff] }
 0x179   :  { %v438_v57 = vld [vmem:[#allocation2 + $0x28] sm:$0xff] }
 0x1d4   :  { %v386_v50 = vpop.permute.xlu0 %385 }
 0x1d5   :  { %397 = vst.msk [vmem:[#allocation2] sm:$0xff] %vm180_vm9, %v386_v50 }
 0x1d6   :  { %401 = vst.msk [vmem:[#allocation2] sm:$0x1] %vm185_vm7, %v752_v45 }
 0x1d7   :  { %413 = vst.msk [vmem:[#allocation2] sm:$0xfe] %vm199_vm10, %v403_v27 }
 0x1d9   :  { %v388_v51 = vpop.permute.xlu1 %387 }
 0x1da   :  { %398 = vst.msk [vmem:[#allocation2 + $0x10] sm:$0xff] %vm180_vm9, %v388_v51 }
 0x1db   :  { %414 = vst.msk [vmem:[#allocation2 + $0x10] sm:$0xff] %vm36_vm0, %v405_v36 }
 0x1dd   :  { %v390_v52 = vpop.permute.xlu0 %389 }
 0x1de   :  { %399 = vst.msk [vmem:[#allocation2 + $0x20] sm:$0xff] %vm180_vm9, %v390_v52  ;;  %v433_v53 = vld [vmem:[#allocation2] sm:$0xff] }
 0x1df   :  { %402 = vst.msk [vmem:[#allocation2 + $0x20] sm:$0x1] %vm185_vm7, %v752_v45  ;;  %542 = vmatmul.mubr.f32.vlgmr.msra.gmra.mrb[4].mxu0 %v433_v53 }
 0x1e0   :  { %415 = vst.msk [vmem:[#allocation2 + $0x20] sm:$0xfe] %vm199_vm10, %v406_v5  ;;  %595 = vmatprep.mubr.msk.f32.mxu0 %vm36_vm0, %v436_v54 }
 0x1e1   :  { %v392_v55 = vpop.permute.xlu1 %391 }
 0x1e2   :  { %400 = vst.msk [vmem:[#allocation2 + $0x30] sm:$0xff] %vm180_vm9, %v392_v55  ;;  %v435_v56 = vld [vmem:[#allocation2 + $0x10] sm:$0xff] }
 0x1e3   :  { %416 = vst.msk [vmem:[#allocation2 + $0x30] sm:$0xff] %vm36_vm0, %v408_v44  ;;  %547 = vmatmul.mubr.f32.gmra.mrb[6].mxu0 %v435_v56 }
 0x1e4   :  { %596 = vmatprep.mubr.msk.f32.mxu0 %vm36_vm0, %v438_v57 }
 0x1e7   :  { %v437_v58 = vld [vmem:[#allocation2 + $0x20] sm:$0xff] }
 0x1e8   :  { %552 = vmatmul.mubr.f32.gmra.mrb[8].mxu0 %v437_v58 }
 0x1e9   :  { %597 = vmatprep.mubr.msk.f32.mxu0 %vm36_vm0, %v440_v59 }
 0x1ea   :  { %v439_v45 = vld [vmem:[#allocation2 + $0x30] sm:$0xff] }
 0x1ec   :  { %557 = vmatmul.mubr.f32.gmra.mrb[10].mxu0 %v439_v45 }
 0x2b2   :  { %v543_v60 = vpop.f32.mrb[4].mxu0 }
 0x2b3   :  { %v544_v61 = vadd.f32 %v543_v60, %v115_v47  ;;  %v545_v62 = vpop.f32.mrb[5].mxu0 }
 0x2b5   :  { %562 = vst [vmem:[#allocation3] sm:$0xff] %v544_v61 }
 0x2b6   :  { %v548_v63 = vpop.f32.mrb[6].mxu0 }
 0x2b7   :  { %v549_v0 = vadd.f32 %v628_v46, %v548_v63  ;;  %v550_v1 = vpop.f32.mrb[7].mxu0 }
 0x2b9   :  { %563 = vst [vmem:[#allocation3 + $0x8] sm:$0xff] %v549_v0 }
 0x2bb   :  { %v553_v2 = vpop.f32.mrb[8].mxu0 }
 0x2bc   :  { %v554_v3 = vadd.f32 %v553_v2, %v125_v49  ;;  %v555_v7 = vpop.f32.mrb[9].mxu0 }
 0x2be   :  { %564 = vst [vmem:[#allocation3 + $0x10] sm:$0xff] %v554_v3 }
 0x2bf   :  { %v558_v8 = vpop.f32.mrb[10].mxu0 }
 0x2c0   :  { %v559_v9 = vadd.f32 %v631_v48, %v558_v8  ;;  %v560_v10 = vpop.f32.mrb[11].mxu0 }
 0x2c2   :  { %565 = vst [vmem:[#allocation3 + $0x18] sm:$0xff] %v559_v9 }
 0x2c3   :  { %737 = shalt.err (!%p734_p4)
}
 0x2c4   :  { %s738_s21 = scalar_lea.hbm %s1123_s6, 512 }
 0x2c5   :  { %p739_p5 = scmp.ne.s32.totalorder %s1123_s6, %s738_s21  ;;  %p742_p6 = scmp.lt.u32.totalorder %s738_s21, %s1123_s6 }
 0x2c7   :  { %p744_p7 = pnand %p742_p6, %p739_p5 }
 0x2c9   :  { %747 = shalt.err (!%p744_p7)
}
 0x2ca   :  { %s754_s25 = smov 128   ;;  %s755_s26 = smov 8  }
 0x2cb   :  { %577 = dma.vmem_to_hbm [thread:$0]  %s572_s4, 512, %s1123_s6, [#allocation4], %s754_s25, %s754_s25, %s755_s26  }
 0x2cc   :  { %748 = dma.done.wait [#allocation4], 512  }
 0x2cd   :  { %749 = vsyncadd [#allocation4], 4294966784 }
 0x2ce   :  { %581 = vsyncpa [#allocation4], 1 }

</bundles_post_ra>
